<compile_context>
chip_gen: v7x
topology: tpu7x:2x2x1
jax: 0.10.0
libtpu: 0.0.40
codegen_flags: <defaults>
</compile_context>

<pallas_src>
import jax
import jax.numpy as jnp
from jax.experimental import pallas as pl
from jax.experimental.pallas import tpu as pltpu

BN_EPS = 1e-5


def decoder_kernel(x_ref, w1_ref, gb_ref, w2_ref, b2_ref, o_ref):
    # x_ref / w1_ref / w2_ref may be bf16 (matmul operands); BN math stays f32.
    x = x_ref[...]                                                   # (B, hidden2)

    # Linear 1 -- no bias: a per-feature constant is exactly cancelled by the
    # BatchNorm mean subtraction, so b1 is never loaded into the kernel.
    h = jnp.dot(x, w1_ref[...], preferred_element_type=jnp.float32)  # (B, h1) f32

    # BatchNorm1d, training mode: biased batch statistics over the batch dim.
    # NOTE: at large B this axis=0 (sublane/XLU) reduction should become a
    # two-pass accumulator over batch tiles; at these sizes one pass is fine.
    mean = jnp.mean(h, axis=0, keepdims=True)                        # (1, hidden1)
    centered = h - mean
    var = jnp.mean(centered * centered, axis=0, keepdims=True)       # biased var
    h = centered * jax.lax.rsqrt(var + BN_EPS)
    h = h * gb_ref[0:1, :] + gb_ref[1:2, :]                          # gamma, beta

    # ReLU, then cast to the matmul dtype for the second MXU pass.
    h = jnp.maximum(h, 0.0).astype(w2_ref.dtype)

    # Linear 2 -- this grid step only sees one N-tile of w2 / b2 / out.
    o_ref[...] = (jnp.dot(h, w2_ref[...], preferred_element_type=jnp.float32)
                  + b2_ref[...]).astype(o_ref.dtype)


def _pick_tn(n, tn_max=512):
    """Largest multiple-of-128 N-tile <= tn_max that divides n (else full n)."""
    if n <= tn_max:
        return n
    for tn in range(tn_max, 127, -128):
        if n % tn == 0:
            return tn
    return n


def decoder_forward(x, params, matmul_dtype=jnp.float32, tn_max=512):
    w1, b1, gamma, beta, w2, b2 = params
    del b1  # mathematically cancelled by BatchNorm mean subtraction
    B, hidden2 = x.shape
    hidden1, n = w2.shape

    tn = _pick_tn(n, tn_max)
    grid = (n // tn,)

    # Pack gamma/beta into one small array -> single DMA descriptor.
    gb = jnp.concatenate([gamma, beta], axis=0)                      # (2, hidden1)

    # Matmul operands in matmul_dtype (bf16 on v6e/v7x halves weight DMA and
    # feeds the MXU at full rate); gb/b2 and the output stay f32.
    xm = x.astype(matmul_dtype)
    w1m = w1.astype(matmul_dtype)
    w2m = w2.astype(matmul_dtype)

    return pl.pallas_call(
        decoder_kernel,
        out_shape=jax.ShapeDtypeStruct((B, n), jnp.float32),
        grid=grid,
        in_specs=[
            pl.BlockSpec((B, hidden2), lambda j: (0, 0)),        # x (resident)
            pl.BlockSpec((hidden2, hidden1), lambda j: (0, 0)),  # w1 (resident)
            pl.BlockSpec((2, hidden1), lambda j: (0, 0)),        # gamma/beta
            pl.BlockSpec((hidden1, tn), lambda j: (0, j)),       # w2 N-tile
            pl.BlockSpec((1, tn), lambda j: (0, j)),             # b2 N-tile
        ],
        out_specs=pl.BlockSpec((B, tn), lambda j: (0, j)),
        compiler_params=pltpu.CompilerParams(
            dimension_semantics=("parallel",)),
    )(xm, w1m, gb, w2m, b2)


def init_params(key, num_features, seq_len):
    """Deterministic init mirroring PyTorch Linear/BatchNorm parameter shapes.

    Linear1: (hidden1, hidden2) weight, (hidden1,) bias  -> stored transposed
    BatchNorm1d(hidden1): weight (gamma), bias (beta)
    Linear2: (n, hidden1) weight, (n,) bias              -> stored transposed
    """
    n = num_features * seq_len
    hidden1 = n // 2
    hidden2 = n // 8

    k1, k2, k3, k4, k5, k6 = jax.random.split(key, 6)
    bound1 = 1.0 / jnp.sqrt(hidden2)
    bound2 = 1.0 / jnp.sqrt(hidden1)

    w1 = jax.random.uniform(k1, (hidden2, hidden1), jnp.float32, -bound1, bound1)
    b1 = jax.random.uniform(k2, (1, hidden1), jnp.float32, -bound1, bound1)
    # gamma/beta perturbed from the PyTorch defaults (1, 0) so the affine path
    # is actually exercised by the correctness check.
    gamma = 1.0 + 0.1 * jax.random.uniform(k5, (1, hidden1), jnp.float32, -1.0, 1.0)
    beta = 0.1 * jax.random.uniform(k6, (1, hidden1), jnp.float32, -1.0, 1.0)
    w2 = jax.random.uniform(k3, (hidden1, n), jnp.float32, -bound2, bound2)
    b2 = jax.random.uniform(k4, (1, n), jnp.float32, -bound2, bound2)
    return (w1, b1, gamma, beta, w2, b2)


def decoder_reference(x, params):
    """Pure-JAX mirror of the PyTorch forward (includes the b1 add)."""
    w1, b1, gamma, beta, w2, b2 = params
    h = x @ w1 + b1
    mean = jnp.mean(h, axis=0, keepdims=True)
    var = jnp.mean((h - mean) ** 2, axis=0, keepdims=True)
    h = (h - mean) / jnp.sqrt(var + BN_EPS)
    h = h * gamma + beta
    h = jnp.maximum(h, 0.0)
    return h @ w2 + b2


# TODO(synk): BatchNorm1d running_mean/running_var buffer updates (eval-mode
# statistics) are not implemented; only training-mode batch statistics.

if __name__ == "__main__":
    # n = 256, hidden1 = 128, hidden2 = 32 -> lane-dense (multiple-of-128)
    # output and hidden1; batch = 8 -> full f32 sublanes.
    num_features, seq_len = 16, 16
    batch = 8

    key = jax.random.PRNGKey(0)
    kx, kp = jax.random.split(key)
    params = init_params(kp, num_features, seq_len)

    hidden2 = (num_features * seq_len) // 8
    x = jax.random.normal(kx, (batch, hidden2), jnp.float32)

    ref = decoder_reference(x, params)

    # f32 matmul path: tight parity with the PyTorch forward.
    out = jax.block_until_ready(decoder_forward(x, params, jnp.float32))
    assert out.shape == (batch, num_features * seq_len)
    assert jnp.allclose(out, ref, atol=1e-4, rtol=1e-4)

    # bf16 matmul-operand path (v6e/v7x MXU-friendly); BN/ReLU stay f32.
    out_bf16 = jax.block_until_ready(decoder_forward(x, params, jnp.bfloat16))
    assert out_bf16.shape == out.shape
    assert jnp.allclose(out_bf16, ref, atol=1e-1, rtol=1e-1)

    print("KERNEL_OK")
</pallas_src>

<mosaic_0001>
module attributes {stable_mosaic.version = 11 : i64} {
  func.func @decoder_kernel(%arg0: i32, %arg1: memref<8x32xf32, #tpu.memory_space<vmem>>, %arg2: memref<32x128xf32, #tpu.memory_space<vmem>>, %arg3: memref<2x128xf32, #tpu.memory_space<vmem>>, %arg4: memref<128x256xf32, #tpu.memory_space<vmem>>, %arg5: memref<1x256xf32, #tpu.memory_space<vmem>>, %arg6: memref<8x256xf32, #tpu.memory_space<vmem>>) attributes {dimension_semantics = [#tpu.dimension_semantics<parallel>], iteration_bounds = array<i64: 1>, scalar_prefetch = 0 : i64, scratch_operands = 0 : i64, tpu.core_type = #tpu.core_type<tc>, window_params = [{pipeline_mode = #tpu.pipeline_mode<synchronous>, transform_indices = @transform_0, window_bounds = array<i64: 8, 32>}, {pipeline_mode = #tpu.pipeline_mode<synchronous>, transform_indices = @transform_1, window_bounds = array<i64: 32, 128>}, {pipeline_mode = #tpu.pipeline_mode<synchronous>, transform_indices = @transform_2, window_bounds = array<i64: 2, 128>}, {transform_indices = @transform_3, window_bounds = array<i64: 128, 256>}, {transform_indices = @transform_4, window_bounds = array<i64: 1, 256>}, {transform_indices = @transform_5, window_bounds = array<i64: 8, 256>}]} {
    %c0 = arith.constant 0 : index
    %c0_0 = arith.constant 0 : index
    %0 = vector.load %arg1[%c0, %c0_0] : memref<8x32xf32, #tpu.memory_space<vmem>>, vector<8x32xf32>
    %c0_1 = arith.constant 0 : index
    %c0_2 = arith.constant 0 : index
    %1 = vector.load %arg2[%c0_1, %c0_2] : memref<32x128xf32, #tpu.memory_space<vmem>>, vector<32x128xf32>
    %cst = arith.constant dense<0.000000e+00> : vector<8x128xf32>
    %2 = tpu.matmul %0, %1, %cst {dimension_numbers = #tpu.dot_dimension_numbers<[1], [0], [0], [1], [0, 0, 1, 1], [], []>} : vector<8x32xf32>, vector<32x128xf32>, vector<8x128xf32> -> vector<8x128xf32>
    %cst_3 = arith.constant dense<0.000000e+00> : vector<128xf32>
    %3 = vector.multi_reduction <add>, %2, %cst_3 [0] : vector<8x128xf32> to vector<128xf32>
    %4 = vector.shape_cast %3 : vector<128xf32> to vector<1x128xf32>
    %cst_4 = arith.constant 8.000000e+00 : f32
    %5 = vector.broadcast %cst_4 : f32 to vector<1x128xf32>
    %6 = arith.divf %4, %5 : vector<1x128xf32>
    %7 = vector.broadcast %6 : vector<1x128xf32> to vector<8x128xf32>
    %8 = arith.subf %2, %7 : vector<8x128xf32>
    %9 = arith.mulf %8, %8 : vector<8x128xf32>
    %cst_5 = arith.constant dense<0.000000e+00> : vector<128xf32>
    %10 = vector.multi_reduction <add>, %9, %cst_5 [0] : vector<8x128xf32> to vector<128xf32>
    %11 = vector.shape_cast %10 : vector<128xf32> to vector<1x128xf32>
    %cst_6 = arith.constant 8.000000e+00 : f32
    %12 = vector.broadcast %cst_6 : f32 to vector<1x128xf32>
    %13 = arith.divf %11, %12 : vector<1x128xf32>
    %cst_7 = arith.constant 9.99999974E-6 : f32
    %14 = vector.broadcast %cst_7 : f32 to vector<1x128xf32>
    %15 = arith.addf %13, %14 : vector<1x128xf32>
    %16 = math.rsqrt %15 : vector<1x128xf32>
    %17 = vector.broadcast %16 : vector<1x128xf32> to vector<8x128xf32>
    %18 = arith.mulf %8, %17 : vector<8x128xf32>
    %c0_8 = arith.constant 0 : index
    %c0_9 = arith.constant 0 : index
    %19 = vector.load %arg3[%c0_8, %c0_9] : memref<2x128xf32, #tpu.memory_space<vmem>>, vector<1x128xf32>
    %20 = vector.broadcast %19 : vector<1x128xf32> to vector<8x128xf32>
    %21 = arith.mulf %18, %20 : vector<8x128xf32>
    %c1 = arith.constant 1 : index
    %c0_10 = arith.constant 0 : index
    %22 = vector.load %arg3[%c1, %c0_10] : memref<2x128xf32, #tpu.memory_space<vmem>>, vector<1x128xf32>
    %23 = vector.broadcast %22 : vector<1x128xf32> to vector<8x128xf32>
    %24 = arith.addf %21, %23 : vector<8x128xf32>
    %cst_11 = arith.constant 0.000000e+00 : f32
    %25 = vector.broadcast %cst_11 : f32 to vector<8x128xf32>
    %26 = arith.maximumf %24, %25 : vector<8x128xf32>
    %c0_12 = arith.constant 0 : index
    %c0_13 = arith.constant 0 : index
    %27 = vector.load %arg4[%c0_12, %c0_13] : memref<128x256xf32, #tpu.memory_space<vmem>>, vector<128x256xf32>
    %cst_14 = arith.constant dense<0.000000e+00> : vector<8x256xf32>
    %28 = tpu.matmul %26, %27, %cst_14 {dimension_numbers = #tpu.dot_dimension_numbers<[1], [0], [0], [1], [0, 0, 1, 1], [], []>} : vector<8x128xf32>, vector<128x256xf32>, vector<8x256xf32> -> vector<8x256xf32>
    %c0_15 = arith.constant 0 : index
    %c0_16 = arith.constant 0 : index
    %29 = vector.load %arg5[%c0_15, %c0_16] : memref<1x256xf32, #tpu.memory_space<vmem>>, vector<1x256xf32>
    %30 = vector.broadcast %29 : vector<1x256xf32> to vector<8x256xf32>
    %31 = arith.addf %28, %30 : vector<8x256xf32>
    %c0_17 = arith.constant 0 : index
    %c0_18 = arith.constant 0 : index
    %32 = vector.load %arg6[%c0_17, %c0_18] : memref<8x256xf32, #tpu.memory_space<vmem>>, vector<8x256xf32>
    tpu.vector_store %arg6[%c0_17, %c0_18], %31 {strides = array<i32>} : memref<8x256xf32, #tpu.memory_space<vmem>>, vector<8x256xf32>,
    return
  }
  func.func @transform_0(%arg0: i32) -> (i32, i32) {
    %c0_i32 = arith.constant 0 : i32
    %c0_i32_0 = arith.constant 0 : i32
    %c0_i32_1 = arith.constant 0 : i32
    return %c0_i32, %c0_i32_0 : i32, i32
  }
  func.func @transform_1(%arg0: i32) -> (i32, i32) {
    %c0_i32 = arith.constant 0 : i32
    %c0_i32_0 = arith.constant 0 : i32
    %c0_i32_1 = arith.constant 0 : i32
    return %c0_i32, %c0_i32_0 : i32, i32
  }
  func.func @transform_2(%arg0: i32) -> (i32, i32) {
    %c0_i32 = arith.constant 0 : i32
    %c0_i32_0 = arith.constant 0 : i32
    %c0_i32_1 = arith.constant 0 : i32
    return %c0_i32, %c0_i32_0 : i32, i32
  }
  func.func @transform_3(%arg0: i32) -> (i32, i32) {
    %c0_i32 = arith.constant 0 : i32
    %c0_i32_0 = arith.constant 0 : i32
    return %c0_i32, %arg0 : i32, i32
  }
  func.func @transform_4(%arg0: i32) -> (i32, i32) {
    %c0_i32 = arith.constant 0 : i32
    %c0_i32_0 = arith.constant 0 : i32
    return %c0_i32, %arg0 : i32, i32
  }
  func.func @transform_5(%arg0: i32) -> (i32, i32) {
    %c0_i32 = arith.constant 0 : i32
    %c0_i32_0 = arith.constant 0 : i32
    return %c0_i32, %arg0 : i32, i32
  }
}

</mosaic_0001>

<bundles_post_ra>
// kernel: tpu_custom_call.1
= control target key start
LH: loop header
LB: loop body
LE: loop exit
PB: predicated region body
PF: predicated region fallthrough
CT: control target
= control target key end

     0   :  { %10 = vsyncpa [#allocation3], 0  ;;  %s567_s0 = inlined_call_operand.hbm [shape: f32[8,32], index: 0, kind: input, shape index: {}]   ;;  %s568_s1 = inlined_call_operand.hbm [shape: f32[32,128], index: 1, kind: input, shape index: {}]   ;;  %s569_s2 = inlined_call_operand.vmem [shape: f32[2,128], index: 2, kind: input, shape index: {}]   ;;  %s570_s3 = inlined_call_operand.hbm [shape: f32[128,256], index: 3, kind: input, shape index: {}]   ;;  %s571_s4 = inlined_call_operand.vmem [shape: f32[1,256], index: 4, kind: input, shape index: {}]   ;;  %s572_s5 = inlined_call_operand.hbm [shape: f32[8,256], index: 5, kind: output, shape index: {}]  }
   0x1   :  { %11 = vsyncpa [#allocation6], 0 }
   0x2   :  { %12 = vsyncpa [#allocation4], 0  ;;  %s469_s18 = smov [#allocation5]   ;;  %s375_s22 = scalar_lea.hbm %s568_s1, 512 }
   0x3   :  { %s28_s19 = sshll.u32 %s469_s18, 4  ;;  %p376_p0 = scmp.ne.s32.totalorder %s568_s1, %s375_s22  ;;  %s29_s19 = int_to_ptr.vmem [resolvable:$true] %s28_s19 }
   0x4   :  { %p379_p1 = scmp.lt.u32.totalorder %s375_s22, %s568_s1 }
   0x6   :  { %p381_p2 = pnand %p379_p1, %p376_p0 }
   0x8   :  { %384 = shalt.err (!%p381_p2)
}
   0x9   :  { %s385_s27 = scalar_lea.vmem %s29_s19, 512  ;;  %p390_p4 = scmp.lt.s32.totalorder %s29_s19, %s29_s19 }
   0xa   :  { %p386_p3 = scmp.ne.s32.totalorder %s29_s19, %s385_s27  ;;  %p391_p5 = scmp.lt.s32.totalorder %s385_s27, %s385_s27 }
   0xc   :  { %p392_p6 = por %p391_p5, %p390_p4 }
   0xe   :  { %p393_p7 = pnand %p392_p6, %p386_p3 }
  0x10   :  { %396 = shalt.err (!%p393_p7)
}
  0x11   :  { %s470_s28 = smov 128   ;;  %s471_s29 = smov 8  }
  0x12   :  { %34 = dma.hbm_to_vmem [thread:$0]  %s568_s1, 512, %s29_s19, [#allocation6], %s470_s28, %s470_s28, %s471_s29  }
  0x13   :  { %s472_s7 = smov [#allocation2]   ;;  %s473_s9 = smov [#allocation7]  }
  0x14   :  { %s19_s8 = sshll.u32 %s472_s7, 4  ;;  %s42_s10 = sshll.u32 %s473_s9, 4  ;;  %s20_s8 = int_to_ptr.vmem [resolvable:$true] %s19_s8  ;;  %s43_s10 = int_to_ptr.vmem [resolvable:$true] %s42_s10 }
  0x15   :  { %s397_s13 = scalar_lea.hbm %s567_s0, 128 }
  0x16   :  { %p398_p8 = scmp.ne.s32.totalorder %s567_s0, %s397_s13  ;;  %p401_p9 = scmp.lt.u32.totalorder %s397_s13, %s567_s0 }
  0x18   :  { %p403_p10 = pnand %p401_p9, %p398_p8 }
  0x1a   :  { %406 = shalt.err (!%p403_p10)
}
  0x1b   :  { %s407_s1 = scalar_lea.vmem %s20_s8, 128  ;;  %p412_p12 = scmp.lt.s32.totalorder %s20_s8, %s20_s8 }
  0x1c   :  { %p408_p11 = scmp.ne.s32.totalorder %s20_s8, %s407_s1  ;;  %p413_p13 = scmp.lt.s32.totalorder %s407_s1, %s407_s1 }
  0x1e   :  { %p414_p0 = por %p413_p13, %p412_p12 }
  0x20   :  { %p415_p1 = pnand %p414_p0, %p408_p11 }
  0x22   :  { %418 = shalt.err (!%p415_p1)
}
  0x23   :  { %22 = dma.hbm_to_vmem [thread:$0]  %s567_s0, 128, %s20_s8, [#allocation3]  }
  0x24   :  { %s419_s22 = scalar_lea.hbm %s570_s3, 4096 }
  0x25   :  { %p420_p2 = scmp.ne.s32.totalorder %s570_s3, %s419_s22  ;;  %p423_p3 = scmp.lt.u32.totalorder %s419_s22, %s570_s3 }
  0x27   :  { %p425_p4 = pnand %p423_p3, %p420_p2 }
  0x29   :  { %428 = shalt.err (!%p425_p4)
}
  0x2a   :  { %s429_s27 = scalar_lea.vmem %s43_s10, 4096  ;;  %p434_p6 = scmp.lt.s32.totalorder %s43_s10, %s43_s10 }
  0x2b   :  { %p430_p5 = scmp.ne.s32.totalorder %s43_s10, %s429_s27  ;;  %p435_p7 = scmp.lt.s32.totalorder %s429_s27, %s429_s27 }
  0x2d   :  { %p436_p8 = por %p435_p7, %p434_p6 }
  0x2f   :  { %p437_p9 = pnand %p436_p8, %p430_p5 }
  0x31   :  { %440 = shalt.err (!%p437_p9)
}
  0x32   :  { %s474_s0 = smov 256   ;;  %s475_s28 = smov 16  }
  0x33   :  { %48 = dma.hbm_to_vmem [thread:$0]  %s570_s3, 4096, %s43_s10, [#allocation6], %s474_s0, %s474_s0, %s475_s28  }
  0x34   :  { %463 = dma.done.wait [#allocation3], 128  }
  0x35   :  { %464 = vsyncadd [#allocation3], 4294967168 }
  0x36   :  { %465 = dma.done.wait [#allocation6], 4608  }
  0x37   :  { %466 = vsyncadd [#allocation6], 4294962688  ;;  %v476_v0 = vmov 0.0|0.0   ;;  %vm477_vm0 = vmmov 0   ;;  %v478_v1 = vmov 0.0   ;;  %v61_v2 = vld [vmem:[#allocation5] sm:$0xff] }
  0x38   :  { %324 = vmatprep.subr.bf16.mxu0 %v476_v0  ;;  %321 = vmatprep.mubr.msk.f32.mxu0 %vm477_vm0, %v478_v1  ;;  %v62_v3 = vld [vmem:[#allocation5 + $0x8] sm:$0xff]  ;;  %v63_v4 = vld [vmem:[#allocation5 + $0x10] sm:$0xff]  ;;  %v64_v6 = vld [vmem:[#allocation5 + $0x18] sm:$0xff]  ;;  %vm65_vm1 = vcmask 261120   ;;  %s479_s11 = smov [#allocation8]  }
  0x39   :  { %280 = vmatprep.mubr.f32.mxu1 %v478_v1  ;;  %v325_v5 = vpack.c.bf16 %v62_v3, %v61_v2  ;;  %v328_v7 = vpack.c.bf16 %v64_v6, %v63_v4  ;;  %v60_v8 = vld [vmem:[#allocation2] sm:$0xff]  ;;  %v173_v9 = vld [vmem:[#allocation7 + $0x8] sm:$0xff]  ;;  %v172_v12 = vld [vmem:[#allocation7] sm:$0xff]  ;;  %s295_s12 = sshll.u32 %s479_s11, 4  ;;  %s296_s12 = int_to_ptr.vmem [resolvable:$true] %s295_s12 }
  0x3a   :  { %v175_v10 = vld [vmem:[#allocation7 + $0x18] sm:$0xff]  ;;  %v174_v13 = vld [vmem:[#allocation7 + $0x10] sm:$0xff]  ;;  %v177_v15 = vld [vmem:[#allocation7 + $0x28] sm:$0xff]  ;;  %p446_p11 = scmp.lt.s32.totalorder %s296_s12, %s296_s12 }
  0x3b   :  { %326 = vmatpush3.bf16.msra.mxu0 %v325_v5  ;;  %v330_v11 = vpack.c.bf16 %v175_v10, %v173_v9  ;;  %v332_v14 = vpack.c.bf16 %v174_v13, %v172_v12  ;;  %v179_v16 = vld [vmem:[#allocation7 + $0x38] sm:$0xff]  ;;  %v176_v18 = vld [vmem:[#allocation7 + $0x20] sm:$0xff]  ;;  %v178_v19 = vld [vmem:[#allocation7 + $0x30] sm:$0xff] }
  0x3c   :  { %327 = vmatprep.subr.bf16.mxu0 %v476_v0  ;;  %v334_v17 = vpack.c.bf16 %v179_v16, %v177_v15  ;;  %v336_v20 = vpack.c.bf16 %v178_v19, %v176_v18  ;;  %v181_v21 = vld [vmem:[#allocation7 + $0x48] sm:$0xff]  ;;  %v183_v22 = vld [vmem:[#allocation7 + $0x58] sm:$0xff]  ;;  %v180_v24 = vld [vmem:[#allocation7 + $0x40] sm:$0xff]  ;;  %v206_v19 = vlaneseq }
  0x3d   :  { %331 = vmatprep.subr.bf16.mxu1 %v330_v11  ;;  %v338_v23 = vpack.c.bf16 %v183_v22, %v181_v21  ;;  %v182_v25 = vld [vmem:[#allocation7 + $0x50] sm:$0xff]  ;;  %v185_v27 = vld [vmem:[#allocation7 + $0x68] sm:$0xff]  ;;  %v187_v28 = vld [vmem:[#allocation7 + $0x78] sm:$0xff] }
  0x3e   :  { %333 = vmatpush1.bf16.msra.mxu1 %v332_v14  ;;  %v340_v26 = vpack.c.bf16 %v182_v25, %v180_v24  ;;  %v342_v29 = vpack.c.bf16 %v187_v28, %v185_v27  ;;  %v184_v30 = vld [vmem:[#allocation7 + $0x60] sm:$0xff]  ;;  %v186_v31 = vld [vmem:[#allocation7 + $0x70] sm:$0xff]  ;;  %v189_v33 = vld [vmem:[#allocation7 + $0x88] sm:$0xff] }
  0x3f   :  { %329 = vmatpush3.bf16.msra.mxu0 %v328_v7  ;;  %335 = vmatprep.subr.bf16.mxu1 %v334_v17  ;;  %v344_v32 = vpack.c.bf16 %v186_v31, %v184_v30  ;;  %v191_v34 = vld [vmem:[#allocation7 + $0x98] sm:$0xff]  ;;  %v188_v36 = vld [vmem:[#allocation7 + $0x80] sm:$0xff]  ;;  %v190_v37 = vld [vmem:[#allocation7 + $0x90] sm:$0xff] }
  0x40   :  { %v346_v35 = vpack.c.bf16 %v191_v34, %v189_v33  ;;  %v348_v38 = vpack.c.bf16 %v190_v37, %v188_v36  ;;  %v193_v39 = vld [vmem:[#allocation7 + $0xa8] sm:$0xff]  ;;  %v195_v40 = vld [vmem:[#allocation7 + $0xb8] sm:$0xff]  ;;  %v192_v42 = vld [vmem:[#allocation7 + $0xa0] sm:$0xff] }
  0x41   :  { %v350_v41 = vpack.c.bf16 %v195_v40, %v193_v39  ;;  %v194_v43 = vld [vmem:[#allocation7 + $0xb0] sm:$0xff]  ;;  %v197_v45 = vld [vmem:[#allocation7 + $0xc8] sm:$0xff]  ;;  %v199_v46 = vld [vmem:[#allocation7 + $0xd8] sm:$0xff] }
  0x42   :  { %322 = vmatmul.mubr.msk.f32.vlgmr.msra.gmra.mrb[0].mxu0 %vm65_vm1, %v60_v8  ;;  %337 = vmatpush1.bf16.msra.mxu1 %v336_v20  ;;  %v352_v44 = vpack.c.bf16 %v194_v43, %v192_v42  ;;  %v354_v47 = vpack.c.bf16 %v199_v46, %v197_v45  ;;  %v196_v48 = vld [vmem:[#allocation7 + $0xc0] sm:$0xff]  ;;  %v198_v49 = vld [vmem:[#allocation7 + $0xd0] sm:$0xff]  ;;  %v201_v51 = vld [vmem:[#allocation7 + $0xe8] sm:$0xff]  ;;  %v207_v20 = vshrl.u32 %v206_v19, 7 }
  0x43   :  { %339 = vmatprep.subr.bf16.mxu1 %v338_v23  ;;  %v356_v50 = vpack.c.bf16 %v198_v49, %v196_v48  ;;  %v203_v52 = vld [vmem:[#allocation7 + $0xf8] sm:$0xff]  ;;  %v200_v53 = vld [vmem:[#allocation7 + $0xe0] sm:$0xff]  ;;  %v202_v55 = vld [vmem:[#allocation7 + $0xf0] sm:$0xff] }
  0x44   :  { %v358_v54 = vpack.c.bf16 %v203_v52, %v201_v51  ;;  %v360_v56 = vpack.c.bf16 %v202_v55, %v200_v53  ;;  %v306_v13 = vld [vmem:[%s569_s2] ss:$0 sm:$0xff]  ;;  %v307_v15 = vld [vmem:[%s569_s2 + $0x1] ss:$0 sm:$0xff]  ;;  %v208_v21 = vsub.s32 0, %v207_v20  ;;  %v212_v23 = vsub.s32 1, %v207_v20 }
  0x45   :  { %v204_v22 = vld [vmem:[%s571_s4] sm:$0x3]  ;;  %s441_s2 = scalar_lea.vmem %s296_s12, 256 }
  0x46   :  { %341 = vmatpush1.bf16.msra.mxu1 %v340_v26  ;;  %v209_v24 = vrot.slane %v204_v22, %v208_v21  ;;  %v213_v25 = vrot.slane %v204_v22, %v212_v23  ;;  %p442_p10 = scmp.ne.s32.totalorder %s296_s12, %s441_s2  ;;  %p447_p12 = scmp.lt.s32.totalorder %s441_s2, %s441_s2 }
  0x47   :  { %343 = vmatprep.subr.bf16.mxu1 %v342_v29 }
  0x48   :  { %p448_p13 = por %p447_p12, %p446_p11 }
  0x4a   :  { %345 = vmatpush1.bf16.msra.mxu1 %v344_v32  ;;  %p449_p0 = pnand %p448_p13, %p442_p10 }
  0x4b   :  { %347 = vmatprep.subr.bf16.mxu1 %v346_v35 }
  0x4e   :  { %349 = vmatpush1.bf16.msra.mxu1 %v348_v38 }
  0x4f   :  { %351 = vmatprep.subr.bf16.mxu1 %v350_v41 }
  0x52   :  { %353 = vmatpush1.bf16.msra.mxu1 %v352_v44 }
  0x53   :  { %355 = vmatprep.subr.bf16.mxu1 %v354_v47 }
  0x56   :  { %357 = vmatpush1.bf16.msra.mxu1 %v356_v50 }
  0x57   :  { %359 = vmatprep.subr.bf16.mxu1 %v358_v54 }
  0x5a   :  { %361 = vmatpush1.bf16.msra.mxu1 %v360_v56 }
 0x115   :  { %v135_v57 = vpop.f32.mrb[0].mxu0 }
 0x116   :  { %v139_v58 = vrot.slane %v135_v57, 4  ;;  %v323_v59 = vpop.f32.mrb[1].mxu0 }
 0x118   :  { %v140_v60 = vadd.f32 %v139_v58, %v135_v57 }
 0x11a   :  { %v141_v61 = vrot.slane %v140_v60, 2 }
 0x11c   :  { %v142_v62 = vadd.f32 %v141_v61, %v140_v60 }
 0x11e   :  { %v143_v63 = vrot.slane %v142_v62, 1 }
 0x120   :  { %v144_v0 = vadd.f32 %v143_v63, %v142_v62 }
 0x122   :  { %v146_v1 = vmul.f32 0.125, %v144_v0 }
 0x124   :  { %v147_v2 = vsub.f32 %v135_v57, %v146_v1 }
 0x126   :  { %v148_v3 = vmul.f32 %v147_v2, %v147_v2 }
 0x128   :  { %v149_v4 = vrot.slane %v148_v3, 4 }
 0x12a   :  { %v150_v5 = vadd.f32 %v149_v4, %v148_v3 }
 0x12c   :  { %v151_v6 = vrot.slane %v150_v5, 2 }
 0x12e   :  { %v152_v7 = vadd.f32 %v151_v6, %v150_v5 }
 0x130   :  { %v153_v8 = vrot.slane %v152_v7, 1 }
 0x132   :  { %v154_v9 = vadd.f32 %v153_v8, %v152_v7 }
 0x134   :  { %v155_v10 = vmul.f32 0.125, %v154_v9 }
 0x136   :  { %v156_v11 = vadd.f32 1e-05, %v155_v10 }
 0x138   :  { %373 = vrsqrt.f32 %v156_v11 }
 0x142   :  { %v374_v12 = vpop.eup %373 }
 0x143   :  { %v158_v14 = vmul.f32 %v374_v12, %v147_v2 }
 0x145   :  { %v164_v16 = vmul.f32 %v306_v13, %v158_v14 }
 0x147   :  { %v170_v17 = vadd.f32 %v307_v15, %v164_v16 }
 0x149   :  { %v171_v18 = vmax.f32 %v170_v17, 0.0 }
 0x14b   :  { %281 = vmatmul.mubr.f32.vlgmr.msra.gmra.mrb[0].mxu1 %v171_v18 }
 0x21e   :  { %v282_v26 = vpop.f32.mrb[0].mxu1 }
 0x21f   :  { %v283_v27 = vadd.f32 %v282_v26, %v209_v24  ;;  %v284_v28 = vpop.f32.mrb[1].mxu1 }
 0x220   :  { %v285_v29 = vadd.f32 %v284_v28, %v213_v25 }
 0x221   :  { %287 = vst [vmem:[#allocation8] sm:$0xff] %v283_v27 }
 0x222   :  { %288 = vst [vmem:[#allocation8 + $0x8] sm:$0xff] %v285_v29 }
 0x223   :  { %452 = shalt.err (!%p449_p0)
}
 0x224   :  { %s453_s14 = scalar_lea.hbm %s572_s5, 256 }
 0x225   :  { %p454_p1 = scmp.ne.s32.totalorder %s572_s5, %s453_s14  ;;  %p457_p2 = scmp.lt.u32.totalorder %s453_s14, %s572_s5 }
 0x227   :  { %p459_p3 = pnand %p457_p2, %p454_p1 }
 0x229   :  { %462 = shalt.err (!%p459_p3)
}
 0x22a   :  { %298 = dma.vmem_to_hbm [thread:$0]  %s296_s12, 256, %s572_s5, [#allocation4]  }
 0x22b   :  { %467 = dma.done.wait [#allocation4], 256  }
 0x22c   :  { %468 = vsyncadd [#allocation4], 4294967040 }
 0x22d   :  { %302 = vsyncpa [#allocation3], 1 }
 0x22e   :  { %303 = vsyncpa [#allocation6], 1 }
 0x22f   :  { %304 = vsyncpa [#allocation4], 1 }

</bundles_post_ra>
